<compile_context>
chip_gen: v7x
topology: tpu7x:2x2x1
jax: 0.10.0
libtpu: 0.0.40
codegen_flags: <defaults>
</compile_context>

<pallas_src>
import functools
import math

import jax
import jax.numpy as jnp
from jax import lax
from jax.experimental import pallas as pl
from jax.experimental.pallas import tpu as pltpu


def _fcblock_kernel(*refs, layer_cfg, eps):
    """refs = (x_ref, *param_refs, o_ref).

    param_refs per layer: Wt (d_in, d_out), b (1, d_out), and if the layer has
    a LayerNorm: gamma (1, d_out), beta (1, d_out).
    layer_cfg: static tuple of (has_ln, has_relu) per layer.
    """
    x_ref = refs[0]
    o_ref = refs[-1]
    params = refs[1:-1]

    h = x_ref[...].astype(jnp.float32)                 # (TILE_N, in_dim)
    p = 0
    for has_ln, has_relu in layer_cfg:                 # static Python loop
        wt = params[p][...].astype(jnp.float32)        # (d_in, d_out)
        b = params[p + 1][...].astype(jnp.float32)     # (1, d_out)
        p += 2
        h = jnp.dot(h, wt, preferred_element_type=jnp.float32) + b
        if has_ln:
            g = params[p][...].astype(jnp.float32)     # (1, d_out)
            beta = params[p + 1][...].astype(jnp.float32)
            p += 2
            mean = jnp.mean(h, axis=-1, keepdims=True)
            var = jnp.mean(jnp.square(h - mean), axis=-1, keepdims=True)
            h = (h - mean) * lax.rsqrt(var + eps)      # EUP rsqrt, f32
            h = h * g + beta
        if has_relu:
            h = jnp.maximum(h, 0.0)
    o_ref[...] = h.astype(o_ref.dtype)


def _round_up(a, m):
    return ((a + m - 1) // m) * m


def fc_block_forward(x, layers, *, eps=1e-5, tile_rows=2048):
    """x: (..., in_features).

    layers: list of dicts, one per FCBlock sub-layer, with keys:
      'w'    : (d_out, d_in) linear weight (torch layout)
      'b'    : (d_out,) bias
      'gamma','beta' : (d_out,) LayerNorm affine params (present iff with_ln)
      'relu' : bool
    Returns (..., out_features).
    """
    in_dim = x.shape[-1]
    lead = x.shape[:-1]
    n = int(math.prod(lead)) if lead else 1
    out_dim = int(layers[-1]["w"].shape[0])

    # Row tiling: multiple of 8 sublanes; pad so the grid divides evenly.
    tile = min(int(tile_rows), _round_up(max(n, 1), 8))
    n_pad = _round_up(n, tile)
    grid = n_pad // tile

    xf = x.reshape(n, in_dim).astype(jnp.float32)
    if n_pad != n:
        xf = jnp.pad(xf, ((0, n_pad - n), (0, 0)))

    # Host-side parameter prep: transpose W, reshape vectors to (1, d_out).
    flat_params = []
    layer_cfg = []
    for layer in layers:
        w = jnp.asarray(layer["w"], jnp.float32)
        d_out = w.shape[0]
        flat_params.append(w.T)                                           # (d_in, d_out)
        flat_params.append(jnp.asarray(layer["b"], jnp.float32).reshape(1, d_out))
        has_ln = "gamma" in layer
        if has_ln:
            flat_params.append(jnp.asarray(layer["gamma"], jnp.float32).reshape(1, d_out))
            flat_params.append(jnp.asarray(layer["beta"], jnp.float32).reshape(1, d_out))
        layer_cfg.append((has_ln, bool(layer.get("relu", False))))

    # Input rows are tiled over the grid; every parameter keeps block (0, 0)
    # so it is fetched once and stays VMEM-resident.
    in_specs = [pl.BlockSpec((tile, in_dim), lambda i: (i, 0))]
    for prm in flat_params:
        in_specs.append(pl.BlockSpec(prm.shape, lambda i: (0, 0)))
    out_specs = pl.BlockSpec((tile, out_dim), lambda i: (i, 0))

    kernel = functools.partial(_fcblock_kernel,
                               layer_cfg=tuple(layer_cfg), eps=float(eps))

    out = pl.pallas_call(
        kernel,
        out_shape=jax.ShapeDtypeStruct((n_pad, out_dim), x.dtype),
        grid=(grid,),
        in_specs=in_specs,
        out_specs=out_specs,
        compiler_params=pltpu.CompilerParams(
            dimension_semantics=("parallel",)),
    )(xf, *flat_params)

    return out[:n].reshape(*lead, out_dim)


def _reference(x, layers, eps=1e-5):
    """Pure-JAX reference matching torch Linear/LayerNorm/ReLU semantics."""
    h = x.astype(jnp.float32)
    for layer in layers:
        w = jnp.asarray(layer["w"], jnp.float32)
        b = jnp.asarray(layer["b"], jnp.float32)
        h = h @ w.T + b
        if "gamma" in layer:
            mean = h.mean(-1, keepdims=True)
            var = ((h - mean) ** 2).mean(-1, keepdims=True)   # biased, as in torch LN
            h = (h - mean) / jnp.sqrt(var + eps)
            h = h * jnp.asarray(layer["gamma"], jnp.float32) \
                + jnp.asarray(layer["beta"], jnp.float32)
        if layer.get("relu", False):
            h = jnp.maximum(h, 0.0)
    return h.astype(x.dtype)


if __name__ == "__main__":
    # FCBlock config: in_features=16, hidden_ch=32, num_hidden_layers=2,
    # out_features=8, outermost_linear=True, with_ln=True.
    in_features, hidden_ch, out_features = 16, 32, 8
    num_hidden_layers = 2
    outermost_linear = True
    with_ln = True
    eps = 1e-5

    dims = [(in_features, hidden_ch)]
    dims += [(hidden_ch, hidden_ch)] * num_hidden_layers
    dims += [(hidden_ch, out_features)]

    key = jax.random.PRNGKey(0)
    layers = []
    for li, (d_in, d_out) in enumerate(dims):
        key, kw, kb = jax.random.split(key, 3)
        # FCBlock.init_weights: kaiming_normal_(fan_in, relu) -> std = sqrt(2/fan_in)
        w = jax.random.normal(kw, (d_out, d_in), jnp.float32) * math.sqrt(2.0 / d_in)
        is_last = (li == len(dims) - 1)
        if is_last and outermost_linear:
            # Linear(): xavier weight re-init is overwritten by kaiming; bias = 0.
            layer = {"w": w, "b": jnp.zeros((d_out,), jnp.float32), "relu": False}
        else:
            # nn.Linear default bias init: U(-1/sqrt(fan_in), 1/sqrt(fan_in)).
            bound = 1.0 / math.sqrt(d_in)
            b = jax.random.uniform(kb, (d_out,), jnp.float32, minval=-bound, maxval=bound)
            layer = {"w": w, "b": b, "relu": True}
            if with_ln:
                # torch nn.LayerNorm defaults: gamma = 1, beta = 0.
                layer["gamma"] = jnp.ones((d_out,), jnp.float32)
                layer["beta"] = jnp.zeros((d_out,), jnp.float32)
        layers.append(layer)

    # Example input: batch=2, seq=8, in_features=16  -> N = 16 rows.
    key, kx = jax.random.split(key)
    x = jax.random.normal(kx, (2, 8, in_features), jnp.float32)

    y = fc_block_forward(x, layers, eps=eps)
    y = jax.block_until_ready(y)

    y_ref = _reference(x, layers, eps=eps)
    assert y.shape == (2, 8, out_features)
    assert jnp.allclose(y, y_ref, atol=1e-4, rtol=1e-4), \
        float(jnp.max(jnp.abs(y - y_ref)))
    print("KERNEL_OK")
</pallas_src>

<mosaic_0001>
module attributes {stable_mosaic.version = 11 : i64} {
  func.func @_fcblock_kernel(%arg0: i32, %arg1: memref<16x16xf32, #tpu.memory_space<vmem>>, %arg2: memref<16x32xf32, #tpu.memory_space<vmem>>, %arg3: memref<1x32xf32, #tpu.memory_space<vmem>>, %arg4: memref<1x32xf32, #tpu.memory_space<vmem>>, %arg5: memref<1x32xf32, #tpu.memory_space<vmem>>, %arg6: memref<32x32xf32, #tpu.memory_space<vmem>>, %arg7: memref<1x32xf32, #tpu.memory_space<vmem>>, %arg8: memref<1x32xf32, #tpu.memory_space<vmem>>, %arg9: memref<1x32xf32, #tpu.memory_space<vmem>>, %arg10: memref<32x32xf32, #tpu.memory_space<vmem>>, %arg11: memref<1x32xf32, #tpu.memory_space<vmem>>, %arg12: memref<1x32xf32, #tpu.memory_space<vmem>>, %arg13: memref<1x32xf32, #tpu.memory_space<vmem>>, %arg14: memref<32x8xf32, #tpu.memory_space<vmem>>, %arg15: memref<1x8xf32, #tpu.memory_space<vmem>>, %arg16: memref<16x8xf32, #tpu.memory_space<vmem>>) attributes {dimension_semantics = [#tpu.dimension_semantics<parallel>], iteration_bounds = array<i64: 1>, scalar_prefetch = 0 : i64, scratch_operands = 0 : i64, tpu.core_type = #tpu.core_type<tc>, window_params = [{transform_indices = @transform_0, window_bounds = array<i64: 16, 16>}, {pipeline_mode = #tpu.pipeline_mode<synchronous>, transform_indices = @transform_1, window_bounds = array<i64: 16, 32>}, {pipeline_mode = #tpu.pipeline_mode<synchronous>, transform_indices = @transform_2, window_bounds = array<i64: 1, 32>}, {pipeline_mode = #tpu.pipeline_mode<synchronous>, transform_indices = @transform_3, window_bounds = array<i64: 1, 32>}, {pipeline_mode = #tpu.pipeline_mode<synchronous>, transform_indices = @transform_4, window_bounds = array<i64: 1, 32>}, {pipeline_mode = #tpu.pipeline_mode<synchronous>, transform_indices = @transform_5, window_bounds = array<i64: 32, 32>}, {pipeline_mode = #tpu.pipeline_mode<synchronous>, transform_indices = @transform_6, window_bounds = array<i64: 1, 32>}, {pipeline_mode = #tpu.pipeline_mode<synchronous>, transform_indices = @transform_7, window_bounds = array<i64: 1, 32>}, {pipeline_mode = #tpu.pipeline_mode<synchronous>, transform_indices = @transform_8, window_bounds = array<i64: 1, 32>}, {pipeline_mode = #tpu.pipeline_mode<synchronous>, transform_indices = @transform_9, window_bounds = array<i64: 32, 32>}, {pipeline_mode = #tpu.pipeline_mode<synchronous>, transform_indices = @transform_10, window_bounds = array<i64: 1, 32>}, {pipeline_mode = #tpu.pipeline_mode<synchronous>, transform_indices = @transform_11, window_bounds = array<i64: 1, 32>}, {pipeline_mode = #tpu.pipeline_mode<synchronous>, transform_indices = @transform_12, window_bounds = array<i64: 1, 32>}, {pipeline_mode = #tpu.pipeline_mode<synchronous>, transform_indices = @transform_13, window_bounds = array<i64: 32, 8>}, {pipeline_mode = #tpu.pipeline_mode<synchronous>, transform_indices = @transform_14, window_bounds = array<i64: 1, 8>}, {transform_indices = @transform_15, window_bounds = array<i64: 16, 8>}]} {
    %c0 = arith.constant 0 : index
    %c0_0 = arith.constant 0 : index
    %0 = vector.load %arg1[%c0, %c0_0] : memref<16x16xf32, #tpu.memory_space<vmem>>, vector<16x16xf32>
    %c0_1 = arith.constant 0 : index
    %c0_2 = arith.constant 0 : index
    %1 = vector.load %arg2[%c0_1, %c0_2] : memref<16x32xf32, #tpu.memory_space<vmem>>, vector<16x32xf32>
    %c0_3 = arith.constant 0 : index
    %c0_4 = arith.constant 0 : index
    %2 = vector.load %arg3[%c0_3, %c0_4] : memref<1x32xf32, #tpu.memory_space<vmem>>, vector<1x32xf32>
    %cst = arith.constant dense<0.000000e+00> : vector<16x32xf32>
    %3 = tpu.matmul %0, %1, %cst {dimension_numbers = #tpu.dot_dimension_numbers<[1], [0], [0], [1], [0, 0, 1, 1], [], []>} : vector<16x16xf32>, vector<16x32xf32>, vector<16x32xf32> -> vector<16x32xf32>
    %4 = vector.broadcast %2 : vector<1x32xf32> to vector<16x32xf32>
    %5 = arith.addf %3, %4 : vector<16x32xf32>
    %c0_5 = arith.constant 0 : index
    %c0_6 = arith.constant 0 : index
    %6 = vector.load %arg4[%c0_5, %c0_6] : memref<1x32xf32, #tpu.memory_space<vmem>>, vector<1x32xf32>
    %c0_7 = arith.constant 0 : index
    %c0_8 = arith.constant 0 : index
    %7 = vector.load %arg5[%c0_7, %c0_8] : memref<1x32xf32, #tpu.memory_space<vmem>>, vector<1x32xf32>
    %cst_9 = arith.constant dense<0.000000e+00> : vector<16xf32>
    %8 = vector.multi_reduction <add>, %5, %cst_9 [1] : vector<16x32xf32> to vector<16xf32>
    %9 = vector.shape_cast %8 : vector<16xf32> to vector<16x1xf32>
    %cst_10 = arith.constant 3.200000e+01 : f32
    %10 = vector.broadcast %cst_10 : f32 to vector<16x1xf32>
    %11 = arith.divf %9, %10 : vector<16x1xf32>
    %12 = vector.broadcast %11 : vector<16x1xf32> to vector<16x32xf32>
    %13 = arith.subf %5, %12 : vector<16x32xf32>
    %14 = arith.mulf %13, %13 : vector<16x32xf32>
    %cst_11 = arith.constant dense<0.000000e+00> : vector<16xf32>
    %15 = vector.multi_reduction <add>, %14, %cst_11 [1] : vector<16x32xf32> to vector<16xf32>
    %16 = vector.shape_cast %15 : vector<16xf32> to vector<16x1xf32>
    %cst_12 = arith.constant 3.200000e+01 : f32
    %17 = vector.broadcast %cst_12 : f32 to vector<16x1xf32>
    %18 = arith.divf %16, %17 : vector<16x1xf32>
    %19 = vector.broadcast %11 : vector<16x1xf32> to vector<16x32xf32>
    %20 = arith.subf %5, %19 : vector<16x32xf32>
    %cst_13 = arith.constant 9.99999974E-6 : f32
    %21 = vector.broadcast %cst_13 : f32 to vector<16x1xf32>
    %22 = arith.addf %18, %21 : vector<16x1xf32>
    %23 = math.rsqrt %22 : vector<16x1xf32>
    %24 = vector.broadcast %23 : vector<16x1xf32> to vector<16x32xf32>
    %25 = arith.mulf %20, %24 : vector<16x32xf32>
    %26 = vector.broadcast %6 : vector<1x32xf32> to vector<16x32xf32>
    %27 = arith.mulf %25, %26 : vector<16x32xf32>
    %28 = vector.broadcast %7 : vector<1x32xf32> to vector<16x32xf32>
    %29 = arith.addf %27, %28 : vector<16x32xf32>
    %cst_14 = arith.constant 0.000000e+00 : f32
    %30 = vector.broadcast %cst_14 : f32 to vector<16x32xf32>
    %31 = arith.maximumf %29, %30 : vector<16x32xf32>
    %c0_15 = arith.constant 0 : index
    %c0_16 = arith.constant 0 : index
    %32 = vector.load %arg6[%c0_15, %c0_16] : memref<32x32xf32, #tpu.memory_space<vmem>>, vector<32x32xf32>
    %c0_17 = arith.constant 0 : index
    %c0_18 = arith.constant 0 : index
    %33 = vector.load %arg7[%c0_17, %c0_18] : memref<1x32xf32, #tpu.memory_space<vmem>>, vector<1x32xf32>
    %cst_19 = arith.constant dense<0.000000e+00> : vector<16x32xf32>
    %34 = tpu.matmul %31, %32, %cst_19 {dimension_numbers = #tpu.dot_dimension_numbers<[1], [0], [0], [1], [0, 0, 1, 1], [], []>} : vector<16x32xf32>, vector<32x32xf32>, vector<16x32xf32> -> vector<16x32xf32>
    %35 = vector.broadcast %33 : vector<1x32xf32> to vector<16x32xf32>
    %36 = arith.addf %34, %35 : vector<16x32xf32>
    %c0_20 = arith.constant 0 : index
    %c0_21 = arith.constant 0 : index
    %37 = vector.load %arg8[%c0_20, %c0_21] : memref<1x32xf32, #tpu.memory_space<vmem>>, vector<1x32xf32>
    %c0_22 = arith.constant 0 : index
    %c0_23 = arith.constant 0 : index
    %38 = vector.load %arg9[%c0_22, %c0_23] : memref<1x32xf32, #tpu.memory_space<vmem>>, vector<1x32xf32>
    %cst_24 = arith.constant dense<0.000000e+00> : vector<16xf32>
    %39 = vector.multi_reduction <add>, %36, %cst_24 [1] : vector<16x32xf32> to vector<16xf32>
    %40 = vector.shape_cast %39 : vector<16xf32> to vector<16x1xf32>
    %cst_25 = arith.constant 3.200000e+01 : f32
    %41 = vector.broadcast %cst_25 : f32 to vector<16x1xf32>
    %42 = arith.divf %40, %41 : vector<16x1xf32>
    %43 = vector.broadcast %42 : vector<16x1xf32> to vector<16x32xf32>
    %44 = arith.subf %36, %43 : vector<16x32xf32>
    %45 = arith.mulf %44, %44 : vector<16x32xf32>
    %cst_26 = arith.constant dense<0.000000e+00> : vector<16xf32>
    %46 = vector.multi_reduction <add>, %45, %cst_26 [1] : vector<16x32xf32> to vector<16xf32>
    %47 = vector.shape_cast %46 : vector<16xf32> to vector<16x1xf32>
    %cst_27 = arith.constant 3.200000e+01 : f32
    %48 = vector.broadcast %cst_27 : f32 to vector<16x1xf32>
    %49 = arith.divf %47, %48 : vector<16x1xf32>
    %50 = vector.broadcast %42 : vector<16x1xf32> to vector<16x32xf32>
    %51 = arith.subf %36, %50 : vector<16x32xf32>
    %cst_28 = arith.constant 9.99999974E-6 : f32
    %52 = vector.broadcast %cst_28 : f32 to vector<16x1xf32>
    %53 = arith.addf %49, %52 : vector<16x1xf32>
    %54 = math.rsqrt %53 : vector<16x1xf32>
    %55 = vector.broadcast %54 : vector<16x1xf32> to vector<16x32xf32>
    %56 = arith.mulf %51, %55 : vector<16x32xf32>
    %57 = vector.broadcast %37 : vector<1x32xf32> to vector<16x32xf32>
    %58 = arith.mulf %56, %57 : vector<16x32xf32>
    %59 = vector.broadcast %38 : vector<1x32xf32> to vector<16x32xf32>
    %60 = arith.addf %58, %59 : vector<16x32xf32>
    %cst_29 = arith.constant 0.000000e+00 : f32
    %61 = vector.broadcast %cst_29 : f32 to vector<16x32xf32>
    %62 = arith.maximumf %60, %61 : vector<16x32xf32>
    %c0_30 = arith.constant 0 : index
    %c0_31 = arith.constant 0 : index
    %63 = vector.load %arg10[%c0_30, %c0_31] : memref<32x32xf32, #tpu.memory_space<vmem>>, vector<32x32xf32>
    %c0_32 = arith.constant 0 : index
    %c0_33 = arith.constant 0 : index
    %64 = vector.load %arg11[%c0_32, %c0_33] : memref<1x32xf32, #tpu.memory_space<vmem>>, vector<1x32xf32>
    %cst_34 = arith.constant dense<0.000000e+00> : vector<16x32xf32>
    %65 = tpu.matmul %62, %63, %cst_34 {dimension_numbers = #tpu.dot_dimension_numbers<[1], [0], [0], [1], [0, 0, 1, 1], [], []>} : vector<16x32xf32>, vector<32x32xf32>, vector<16x32xf32> -> vector<16x32xf32>
    %66 = vector.broadcast %64 : vector<1x32xf32> to vector<16x32xf32>
    %67 = arith.addf %65, %66 : vector<16x32xf32>
    %c0_35 = arith.constant 0 : index
    %c0_36 = arith.constant 0 : index
    %68 = vector.load %arg12[%c0_35, %c0_36] : memref<1x32xf32, #tpu.memory_space<vmem>>, vector<1x32xf32>
    %c0_37 = arith.constant 0 : index
    %c0_38 = arith.constant 0 : index
    %69 = vector.load %arg13[%c0_37, %c0_38] : memref<1x32xf32, #tpu.memory_space<vmem>>, vector<1x32xf32>
    %cst_39 = arith.constant dense<0.000000e+00> : vector<16xf32>
    %70 = vector.multi_reduction <add>, %67, %cst_39 [1] : vector<16x32xf32> to vector<16xf32>
    %71 = vector.shape_cast %70 : vector<16xf32> to vector<16x1xf32>
    %cst_40 = arith.constant 3.200000e+01 : f32
    %72 = vector.broadcast %cst_40 : f32 to vector<16x1xf32>
    %73 = arith.divf %71, %72 : vector<16x1xf32>
    %74 = vector.broadcast %73 : vector<16x1xf32> to vector<16x32xf32>
    %75 = arith.subf %67, %74 : vector<16x32xf32>
    %76 = arith.mulf %75, %75 : vector<16x32xf32>
    %cst_41 = arith.constant dense<0.000000e+00> : vector<16xf32>
    %77 = vector.multi_reduction <add>, %76, %cst_41 [1] : vector<16x32xf32> to vector<16xf32>
    %78 = vector.shape_cast %77 : vector<16xf32> to vector<16x1xf32>
    %cst_42 = arith.constant 3.200000e+01 : f32
    %79 = vector.broadcast %cst_42 : f32 to vector<16x1xf32>
    %80 = arith.divf %78, %79 : vector<16x1xf32>
    %81 = vector.broadcast %73 : vector<16x1xf32> to vector<16x32xf32>
    %82 = arith.subf %67, %81 : vector<16x32xf32>
    %cst_43 = arith.constant 9.99999974E-6 : f32
    %83 = vector.broadcast %cst_43 : f32 to vector<16x1xf32>
    %84 = arith.addf %80, %83 : vector<16x1xf32>
    %85 = math.rsqrt %84 : vector<16x1xf32>
    %86 = vector.broadcast %85 : vector<16x1xf32> to vector<16x32xf32>
    %87 = arith.mulf %82, %86 : vector<16x32xf32>
    %88 = vector.broadcast %68 : vector<1x32xf32> to vector<16x32xf32>
    %89 = arith.mulf %87, %88 : vector<16x32xf32>
    %90 = vector.broadcast %69 : vector<1x32xf32> to vector<16x32xf32>
    %91 = arith.addf %89, %90 : vector<16x32xf32>
    %cst_44 = arith.constant 0.000000e+00 : f32
    %92 = vector.broadcast %cst_44 : f32 to vector<16x32xf32>
    %93 = arith.maximumf %91, %92 : vector<16x32xf32>
    %c0_45 = arith.constant 0 : index
    %c0_46 = arith.constant 0 : index
    %94 = vector.load %arg14[%c0_45, %c0_46] : memref<32x8xf32, #tpu.memory_space<vmem>>, vector<32x8xf32>
    %c0_47 = arith.constant 0 : index
    %c0_48 = arith.constant 0 : index
    %95 = vector.load %arg15[%c0_47, %c0_48] : memref<1x8xf32, #tpu.memory_space<vmem>>, vector<1x8xf32>
    %cst_49 = arith.constant dense<0.000000e+00> : vector<16x8xf32>
    %96 = tpu.matmul %93, %94, %cst_49 {dimension_numbers = #tpu.dot_dimension_numbers<[1], [0], [0], [1], [0, 0, 1, 1], [], []>} : vector<16x32xf32>, vector<32x8xf32>, vector<16x8xf32> -> vector<16x8xf32>
    %97 = vector.broadcast %95 : vector<1x8xf32> to vector<16x8xf32>
    %98 = arith.addf %96, %97 : vector<16x8xf32>
    %c0_50 = arith.constant 0 : index
    %c0_51 = arith.constant 0 : index
    %99 = vector.load %arg16[%c0_50, %c0_51] : memref<16x8xf32, #tpu.memory_space<vmem>>, vector<16x8xf32>
    tpu.vector_store %arg16[%c0_50, %c0_51], %98 {strides = array<i32>} : memref<16x8xf32, #tpu.memory_space<vmem>>, vector<16x8xf32>,
    return
  }
  func.func @transform_0(%arg0: i32) -> (i32, i32) {
    %c0_i32 = arith.constant 0 : i32
    %c0_i32_0 = arith.constant 0 : i32
    return %arg0, %c0_i32 : i32, i32
  }
  func.func @transform_1(%arg0: i32) -> (i32, i32) {
    %c0_i32 = arith.constant 0 : i32
    %c0_i32_0 = arith.constant 0 : i32
    %c0_i32_1 = arith.constant 0 : i32
    return %c0_i32, %c0_i32_0 : i32, i32
  }
  func.func @transform_2(%arg0: i32) -> (i32, i32) {
    %c0_i32 = arith.constant 0 : i32
    %c0_i32_0 = arith.constant 0 : i32
    %c0_i32_1 = arith.constant 0 : i32
    return %c0_i32, %c0_i32_0 : i32, i32
  }
  func.func @transform_3(%arg0: i32) -> (i32, i32) {
    %c0_i32 = arith.constant 0 : i32
    %c0_i32_0 = arith.constant 0 : i32
    %c0_i32_1 = arith.constant 0 : i32
    return %c0_i32, %c0_i32_0 : i32, i32
  }
  func.func @transform_4(%arg0: i32) -> (i32, i32) {
    %c0_i32 = arith.constant 0 : i32
    %c0_i32_0 = arith.constant 0 : i32
    %c0_i32_1 = arith.constant 0 : i32
    return %c0_i32, %c0_i32_0 : i32, i32
  }
  func.func @transform_5(%arg0: i32) -> (i32, i32) {
    %c0_i32 = arith.constant 0 : i32
    %c0_i32_0 = arith.constant 0 : i32
    %c0_i32_1 = arith.constant 0 : i32
    return %c0_i32, %c0_i32_0 : i32, i32
  }
  func.func @transform_6(%arg0: i32) -> (i32, i32) {
    %c0_i32 = arith.constant 0 : i32
    %c0_i32_0 = arith.constant 0 : i32
    %c0_i32_1 = arith.constant 0 : i32
    return %c0_i32, %c0_i32_0 : i32, i32
  }
  func.func @transform_7(%arg0: i32) -> (i32, i32) {
    %c0_i32 = arith.constant 0 : i32
    %c0_i32_0 = arith.constant 0 : i32
    %c0_i32_1 = arith.constant 0 : i32
    return %c0_i32, %c0_i32_0 : i32, i32
  }
  func.func @transform_8(%arg0: i32) -> (i32, i32) {
    %c0_i32 = arith.constant 0 : i32
    %c0_i32_0 = arith.constant 0 : i32
    %c0_i32_1 = arith.constant 0 : i32
    return %c0_i32, %c0_i32_0 : i32, i32
  }
  func.func @transform_9(%arg0: i32) -> (i32, i32) {
    %c0_i32 = arith.constant 0 : i32
    %c0_i32_0 = arith.constant 0 : i32
    %c0_i32_1 = arith.constant 0 : i32
    return %c0_i32, %c0_i32_0 : i32, i32
  }
  func.func @transform_10(%arg0: i32) -> (i32, i32) {
    %c0_i32 = arith.constant 0 : i32
    %c0_i32_0 = arith.constant 0 : i32
    %c0_i32_1 = arith.constant 0 : i32
    return %c0_i32, %c0_i32_0 : i32, i32
  }
  func.func @transform_11(%arg0: i32) -> (i32, i32) {
    %c0_i32 = arith.constant 0 : i32
    %c0_i32_0 = arith.constant 0 : i32
    %c0_i32_1 = arith.constant 0 : i32
    return %c0_i32, %c0_i32_0 : i32, i32
  }
  func.func @transform_12(%arg0: i32) -> (i32, i32) {
    %c0_i32 = arith.constant 0 : i32
    %c0_i32_0 = arith.constant 0 : i32
    %c0_i32_1 = arith.constant 0 : i32
    return %c0_i32, %c0_i32_0 : i32, i32
  }
  func.func @transform_13(%arg0: i32) -> (i32, i32) {
    %c0_i32 = arith.constant 0 : i32
    %c0_i32_0 = arith.constant 0 : i32
    %c0_i32_1 = arith.constant 0 : i32
    return %c0_i32, %c0_i32_0 : i32, i32
  }
  func.func @transform_14(%arg0: i32) -> (i32, i32) {
    %c0_i32 = arith.constant 0 : i32
    %c0_i32_0 = arith.constant 0 : i32
    %c0_i32_1 = arith.constant 0 : i32
    return %c0_i32, %c0_i32_0 : i32, i32
  }
  func.func @transform_15(%arg0: i32) -> (i32, i32) {
    %c0_i32 = arith.constant 0 : i32
    %c0_i32_0 = arith.constant 0 : i32
    return %arg0, %c0_i32 : i32, i32
  }
}

</mosaic_0001>

<bundles_post_ra>
// kernel: tpu_custom_call.1
= control target key start
LH: loop header
LB: loop body
LE: loop exit
PB: predicated region body
PF: predicated region fallthrough
CT: control target
= control target key end

     0   :  { %20 = vsyncpa [#allocation3], 0  ;;  %s1164_s0 = inlined_call_operand.hbm [shape: f32[16,16], index: 0, kind: input, shape index: {}]   ;;  %s1165_s1 = inlined_call_operand.hbm [shape: f32[16,32], index: 1, kind: input, shape index: {}]   ;;  %s1166_s2 = inlined_call_operand.vmem [shape: f32[1,32], index: 2, kind: input, shape index: {}]   ;;  %s1167_s3 = inlined_call_operand.vmem [shape: f32[1,32], index: 3, kind: input, shape index: {}]   ;;  %s1168_s4 = inlined_call_operand.hbm [shape: f32[1,32], index: 4, kind: input, shape index: {}]   ;;  %s1169_s5 = inlined_call_operand.vmem [shape: f32[32,32], index: 5, kind: input, shape index: {}]   ;;  %s1170_s6 = inlined_call_operand.hbm [shape: f32[1,32], index: 6, kind: input, shape index: {}]   ;;  %s1171_s7 = inlined_call_operand.hbm [shape: f32[1,32], index: 7, kind: input, shape index: {}]   ;;  %s1172_s8 = inlined_call_operand.hbm [shape: f32[1,32], index: 8, kind: input, shape index: {}]   ;;  %s1173_s9 = inlined_call_operand.vmem [shape: f32[32,32], index: 9, kind: input, shape index: {}]   ;;  %s1174_s10 = inlined_call_operand.vmem [shape: f32[1,32], index: 10, kind: input, shape index: {}]   ;;  %s1175_s11 = inlined_call_operand.vmem [shape: f32[1,32], index: 11, kind: input, shape index: {}]   ;;  %s1176_s12 = inlined_call_operand.vmem [shape: f32[1,32], index: 12, kind: input, shape index: {}]   ;;  %s1177_s13 = inlined_call_operand.vmem [shape: f32[32,8], index: 13, kind: input, shape index: {}]   ;;  %s1178_s14 = inlined_call_operand.vmem [shape: f32[1,8], index: 14, kind: input, shape index: {}]   ;;  %s1179_s15 = inlined_call_operand.vmem [shape: f32[16,8], index: 15, kind: output, shape index: {}]  }
   0x1   :  { %21 = vsyncpa [#allocation5], 0 }
   0x2   :  { %22 = vsyncpa [#allocation8], 0 }
   0x3   :  { %23 = vsyncpa [#allocation11], 0  ;;  %s912_s18 = smov [#allocation4]   ;;  %s913_s20 = smov [#allocation7]  }
   0x4   :  { %s41_s19 = sshll.u32 %s912_s18, 4  ;;  %s70_s21 = sshll.u32 %s913_s20, 4  ;;  %s42_s19 = int_to_ptr.vmem [resolvable:$true] %s41_s19  ;;  %s1000_s21 = int_to_ptr.vmem [resolvable:$true] %s70_s21 }
   0x5   :  { %s772_s24 = scalar_lea.hbm %s1165_s1, 256 }
   0x6   :  { %p773_p0 = scmp.ne.s32.totalorder %s1165_s1, %s772_s24  ;;  %p776_p1 = scmp.lt.u32.totalorder %s772_s24, %s1165_s1 }
   0x8   :  { %p778_p2 = pnand %p776_p1, %p773_p0 }
   0xa   :  { %781 = shalt.err (!%p778_p2)
}
   0xb   :  { %s782_s29 = scalar_lea.vmem %s42_s19, 256  ;;  %p787_p4 = scmp.lt.s32.totalorder %s42_s19, %s42_s19 }
   0xc   :  { %p783_p3 = scmp.ne.s32.totalorder %s42_s19, %s782_s29  ;;  %p788_p5 = scmp.lt.s32.totalorder %s782_s29, %s782_s29 }
   0xe   :  { %p789_p6 = por %p788_p5, %p787_p4 }
  0x10   :  { %p790_p7 = pnand %p789_p6, %p783_p3 }
  0x12   :  { %793 = shalt.err (!%p790_p7)
}
  0x13   :  { %s914_s30 = smov 128   ;;  %s915_s16 = smov 8  }
  0x14   :  { %47 = dma.hbm_to_vmem [thread:$0]  %s1165_s1, 256, %s42_s19, [#allocation5], %s914_s30, %s914_s30, %s915_s16  }
  0x15   :  { %s794_s23 = scalar_lea.hbm %s1170_s6, 16 }
  0x16   :  { %p795_p8 = scmp.ne.s32.totalorder %s1170_s6, %s794_s23  ;;  %p798_p9 = scmp.lt.u32.totalorder %s794_s23, %s1170_s6 }
  0x18   :  { %p800_p10 = pnand %p798_p9, %p795_p8 }
  0x1a   :  { %803 = shalt.err (!%p800_p10)
}
  0x1b   :  { %s804_s28 = scalar_lea.vmem %s1000_s21, 16  ;;  %s808_s1 = scalar_lea.vmem %s1000_s21, 32 }
  0x1c   :  { %p805_p11 = scmp.ne.s32.totalorder %s1000_s21, %s804_s28  ;;  %p809_p12 = scmp.lt.s32.totalorder %s1000_s21, %s1000_s21 }
  0x1d   :  { %p810_p13 = scmp.lt.s32.totalorder %s808_s1, %s804_s28 }
  0x1f   :  { %p811_p0 = por %p810_p13, %p809_p12 }
  0x21   :  { %p812_p1 = pnand %p811_p0, %p805_p11 }
  0x23   :  { %815 = shalt.err (!%p812_p1)
}
  0x24   :  { %73 = dma.hbm_to_vmem [thread:$0]  %s1170_s6, 16, %s1000_s21, [#allocation8]  }
  0x25   :  { %s916_s17 = smov [#allocation2]   ;;  %s917_s20 = smov [#allocation6]  }
  0x26   :  { %s29_s18 = sshll.u32 %s916_s17, 4  ;;  %s58_s22 = sshll.u32 %s917_s20, 4  ;;  %s30_s18 = int_to_ptr.vmem [resolvable:$true] %s29_s18  ;;  %s59_s22 = int_to_ptr.vmem [resolvable:$true] %s58_s22 }
  0x27   :  { %s816_s25 = scalar_lea.hbm %s1164_s0, 256 }
  0x28   :  { %p817_p2 = scmp.ne.s32.totalorder %s1164_s0, %s816_s25  ;;  %p820_p3 = scmp.lt.u32.totalorder %s816_s25, %s1164_s0 }
  0x2a   :  { %p822_p4 = pnand %p820_p3, %p817_p2 }
  0x2c   :  { %825 = shalt.err (!%p822_p4)
}
  0x2d   :  { %s826_s6 = scalar_lea.vmem %s30_s18, 256  ;;  %p831_p6 = scmp.lt.s32.totalorder %s30_s18, %s30_s18 }
  0x2e   :  { %p827_p5 = scmp.ne.s32.totalorder %s30_s18, %s826_s6  ;;  %p832_p7 = scmp.lt.s32.totalorder %s826_s6, %s826_s6 }
  0x30   :  { %p833_p8 = por %p832_p7, %p831_p6 }
  0x32   :  { %p834_p9 = pnand %p833_p8, %p827_p5 }
  0x34   :  { %837 = shalt.err (!%p834_p9)
}
  0x35   :  { %35 = dma.hbm_to_vmem [thread:$0]  %s1164_s0, 256, %s30_s18, [#allocation3], %s914_s30, %s914_s30, %s915_s16  }
  0x36   :  { %s838_s20 = scalar_lea.hbm %s1168_s4, 16 }
  0x37   :  { %p839_p10 = scmp.ne.s32.totalorder %s1168_s4, %s838_s20  ;;  %p842_p11 = scmp.lt.u32.totalorder %s838_s20, %s1168_s4 }
  0x39   :  { %p844_p12 = pnand %p842_p11, %p839_p10 }
  0x3b   :  { %847 = shalt.err (!%p844_p12)
}
  0x3c   :  { %s848_s27 = scalar_lea.vmem %s59_s22, 16  ;;  %s852_s28 = scalar_lea.vmem %s59_s22, 32 }
  0x3d   :  { %p849_p13 = scmp.ne.s32.totalorder %s59_s22, %s848_s27  ;;  %p853_p0 = scmp.lt.s32.totalorder %s59_s22, %s59_s22 }
  0x3e   :  { %p854_p1 = scmp.lt.s32.totalorder %s852_s28, %s848_s27 }
  0x40   :  { %p855_p2 = por %p854_p1, %p853_p0 }
  0x42   :  { %p856_p3 = pnand %p855_p2, %p849_p13 }
  0x44   :  { %859 = shalt.err (!%p856_p3)
}
  0x45   :  { %61 = dma.hbm_to_vmem [thread:$0]  %s1168_s4, 16, %s59_s22, [#allocation5]  }
  0x46   :  { %s918_s16 = smov [#allocation9]   ;;  %s919_s1 = smov [#allocation10]  }
  0x47   :  { %s80_s18 = sshll.u32 %s918_s16, 4  ;;  %s90_s6 = sshll.u32 %s919_s1, 4  ;;  %s81_s18 = int_to_ptr.vmem [resolvable:$true] %s80_s18  ;;  %s91_s6 = int_to_ptr.vmem [resolvable:$true] %s90_s6 }
  0x48   :  { %s860_s29 = scalar_lea.hbm %s1171_s7, 16 }
  0x49   :  { %p861_p4 = scmp.ne.s32.totalorder %s1171_s7, %s860_s29  ;;  %p864_p5 = scmp.lt.u32.totalorder %s860_s29, %s1171_s7 }
  0x4b   :  { %p866_p6 = pnand %p864_p5, %p861_p4 }
  0x4d   :  { %869 = shalt.err (!%p866_p6)
}
  0x4e   :  { %s870_s4 = scalar_lea.vmem %s81_s18, 16  ;;  %s874_s22 = scalar_lea.vmem %s81_s18, 32 }
  0x4f   :  { %p871_p7 = scmp.ne.s32.totalorder %s81_s18, %s870_s4  ;;  %p875_p8 = scmp.lt.s32.totalorder %s81_s18, %s81_s18 }
  0x50   :  { %p876_p9 = scmp.lt.s32.totalorder %s874_s22, %s870_s4 }
  0x52   :  { %p877_p10 = por %p876_p9, %p875_p8 }
  0x54   :  { %p878_p11 = pnand %p877_p10, %p871_p7 }
  0x56   :  { %881 = shalt.err (!%p878_p11)
}
  0x57   :  { %83 = dma.hbm_to_vmem [thread:$0]  %s1171_s7, 16, %s81_s18, [#allocation8]  }
  0x58   :  { %s882_s0 = scalar_lea.hbm %s1172_s8, 16 }
  0x59   :  { %p883_p12 = scmp.ne.s32.totalorder %s1172_s8, %s882_s0  ;;  %p886_p13 = scmp.lt.u32.totalorder %s882_s0, %s1172_s8 }
  0x5b   :  { %p888_p0 = pnand %p886_p13, %p883_p12 }
  0x5d   :  { %891 = shalt.err (!%p888_p0)
}
  0x5e   :  { %s892_s19 = scalar_lea.vmem %s91_s6, 16  ;;  %s896_s29 = scalar_lea.vmem %s91_s6, 32 }
  0x5f   :  { %p893_p1 = scmp.ne.s32.totalorder %s91_s6, %s892_s19  ;;  %p897_p2 = scmp.lt.s32.totalorder %s91_s6, %s91_s6 }
  0x60   :  { %p898_p3 = scmp.lt.s32.totalorder %s896_s29, %s892_s19 }
  0x62   :  { %p899_p4 = por %p898_p3, %p897_p2 }
  0x64   :  { %p900_p5 = pnand %p899_p4, %p893_p1 }
  0x66   :  { %903 = shalt.err (!%p900_p5)
}
  0x67   :  { %93 = dma.hbm_to_vmem [thread:$0]  %s1172_s8, 16, %s91_s6, [#allocation11]  }
  0x68   :  { %904 = dma.done.wait [#allocation3], 256  }
  0x69   :  { %905 = vsyncadd [#allocation3], 4294967040 }
  0x6a   :  { %906 = dma.done.wait [#allocation5], 272  }
  0x6b   :  { %907 = vsyncadd [#allocation5], 4294967024 }
  0x6c   :  { %908 = dma.done.wait [#allocation8], 32  }
  0x6d   :  { %909 = vsyncadd [#allocation8], 4294967264 }
  0x6e   :  { %910 = dma.done.wait [#allocation11], 16  }
  0x6f   :  { %911 = vsyncadd [#allocation11], 4294967280  ;;  %vm135_vm0 = vcmask 130048   ;;  %v126_v0 = vld [vmem:[#allocation4] sm:$0xff]  ;;  %v127_v1 = vld [vmem:[#allocation4 + $0x8] sm:$0xff]  ;;  %vm219_vm1 = vcmask 261120  }
  0x70   :  { %v124_v2 = vld [vmem:[#allocation2] sm:$0xff]  ;;  %v724_v3 = vpack.c.bf16 %v127_v1, %v126_v0  ;;  %v125_v4 = vld [vmem:[#allocation2 + $0x8] sm:$0xff]  ;;  %v267_v24 = vld [vmem:[%s1169_s5 + $0x10] sm:$0xff]  ;;  %vm633_vm2 = vcmask 64512  }
  0x71   :  { %688 = vmatprep.mubr.msk.f32.mxu0 %vm135_vm0, %v124_v2  ;;  %v644_v5 = vld [vmem:[%s1166_s2] ss:$0 sm:$0xff]  ;;  %v266_v23 = vld [vmem:[%s1169_s5 + $0x8] sm:$0xff]  ;;  %v268_v26 = vld [vmem:[%s1169_s5 + $0x18] sm:$0xff] }
  0x72   :  { %725 = vmatprep.subr.bf16.mxu0 %v724_v3  ;;  %v265_v22 = vld [vmem:[%s1169_s5] sm:$0xff]  ;;  %v732_v27 = vpack.c.bf16 %v268_v26, %v267_v24  ;;  %v404_v0 = vld [vmem:[%s1173_s9 + $0x8] sm:$0xff]  ;;  %v405_v2 = vld [vmem:[%s1173_s9 + $0x10] sm:$0xff] }
  0x73   :  { %727 = vmatpush3.bf16.msra.mxu0 %v724_v3  ;;  %v728_v25 = vpack.c.bf16 %v266_v23, %v265_v22  ;;  %v647_v35 = vld [vmem:[%s1167_s3] ss:$0 sm:$0xff]  ;;  %v649_v46 = vld [vmem:[#allocation7] ss:$0 sm:$0xff]  ;;  %v406_v3 = vld [vmem:[%s1173_s9 + $0x18] sm:$0xff] }
  0x74   :  { %v648_v37 = vld [vmem:[#allocation6] ss:$0 sm:$0xff] }
  0x75   :  { %729 = vmatprep.subr.bf16.mxu1 %v728_v25  ;;  %v403_v63 = vld [vmem:[%s1173_s9] sm:$0xff] }
  0x76   :  { %689 = vmatmul.mubr.msk.f32.vlgmr.msra.gmra.mrb[0].mxu0 %vm135_vm0, %v125_v4  ;;  %731 = vmatpush3.bf16.msra.mxu1 %v728_v25  ;;  %v736_v1 = vpack.c.bf16 %v404_v0, %v403_v63  ;;  %v740_v4 = vpack.c.bf16 %v406_v3, %v405_v2  ;;  %v654_v23 = vld [vmem:[%s1174_s10] ss:$0 sm:$0xff] }
  0x77   :  { %733 = vmatprep.subr.bf16.mxu1 %v732_v27  ;;  %v659_v0 = vld [vmem:[%s1178_s14] ss:$0 sm:$0xff] }
  0x78   :  { %737 = vmatprep.subr.bf16.mxu0 %v736_v1 }
  0x79   :  { %739 = vmatpush3.bf16.msra.mxu0 %v736_v1 }
  0x7a   :  { %735 = vmatpush3.bf16.msra.mxu1 %v732_v27  ;;  %741 = vmatprep.subr.bf16.mxu0 %v740_v4 }
  0x7d   :  { %743 = vmatpush3.bf16.msra.mxu0 %v740_v4 }
 0x149   :  { %v690_v6 = vpop.f32.mrb[0].mxu0 }
 0x14a   :  { %v208_v7 = vpop.f32.mrb[1].mxu0  ;;  %v214_v9 = vadd.f32 %v690_v6, %v644_v5 }
 0x14b   :  { %v209_v8 = vadd.f32 %v644_v5, %v208_v7 }
 0x14c   :  { %v223_v11 = vsel %vm219_vm1, %v214_v9, 0.0 }
 0x14d   :  { %v220_v10 = vsel %vm219_vm1, %v209_v8, 0.0 }
 0x14e   :  { %221 = vadd.xlane.f32.xlu0 %v220_v10 }
 0x152   :  { %224 = vadd.xlane.f32.xlu0 %v223_v11 }
 0x1db   :  { %v222_v12 = vpop.xlane.xlu0 %221 }
 0x1dc   :  { %v227_v13 = vmul.f32 0.03125, %v222_v12  ;;  %v652_v12 = vld [vmem:[#allocation9] ss:$0 sm:$0xff] }
 0x1de   :  { %v229_v14 = vsub.f32 %v209_v8, %v227_v13 }
 0x1df   :  { %v225_v15 = vpop.xlane.xlu0 %224 }
 0x1e0   :  { %v228_v16 = vmul.f32 0.03125, %v225_v15  ;;  %v231_v17 = vmul.f32 %v229_v14, %v229_v14  ;;  %v653_v15 = vld [vmem:[#allocation10] ss:$0 sm:$0xff] }
 0x1e2   :  { %v230_v18 = vsub.f32 %v214_v9, %v228_v16  ;;  %v233_v19 = vsel %vm219_vm1, %v231_v17, 0.0 }
 0x1e3   :  { %234 = vadd.xlane.f32.xlu1 %v233_v19 }
 0x1e4   :  { %v232_v20 = vmul.f32 %v230_v18, %v230_v18 }
 0x1e6   :  { %v236_v21 = vsel %vm219_vm1, %v232_v20, 0.0 }
 0x1e7   :  { %237 = vadd.xlane.f32.xlu1 %v236_v21 }
 0x270   :  { %v235_v28 = vpop.xlane.xlu1 %234 }
 0x271   :  { %v239_v29 = vmul.f32 0.03125, %v235_v28 }
 0x273   :  { %v241_v30 = vadd.f32 1e-05, %v239_v29 }
 0x274   :  { %v238_v31 = vpop.xlane.xlu1 %237 }
 0x275   :  { %760 = vrsqrt.f32 %v241_v30  ;;  %v240_v32 = vmul.f32 0.03125, %v238_v31 }
 0x277   :  { %v242_v33 = vadd.f32 1e-05, %v240_v32 }
 0x279   :  { %762 = vrsqrt.f32 %v242_v33 }
 0x27f   :  { %v761_v34 = vpop.eup %760 }
 0x280   :  { %v245_v36 = vmul.f32 %v761_v34, %v229_v14 }
 0x282   :  { %v253_v38 = vmul.f32 %v647_v35, %v245_v36 }
 0x283   :  { %v763_v39 = vpop.eup %762 }
 0x284   :  { %v246_v40 = vmul.f32 %v763_v39, %v230_v18  ;;  %v261_v41 = vadd.f32 %v648_v37, %v253_v38 }
 0x286   :  { %v254_v42 = vmul.f32 %v647_v35, %v246_v40  ;;  %v263_v43 = vmax.f32 %v261_v41, 0.0  ;;  %v541_v40 = vld [vmem:[%s1177_s13] sm:$0xff]  ;;  %v542_v41 = vld [vmem:[%s1177_s13 + $0x8] sm:$0xff] }
 0x288   :  { %v262_v44 = vadd.f32 %v648_v37, %v254_v42  ;;  %699 = vmatprep.mubr.msk.f32.mxu1 %vm219_vm1, %v263_v43  ;;  %v744_v42 = vpack.c.bf16 %v542_v41, %v541_v40  ;;  %v543_v43 = vld [vmem:[%s1177_s13 + $0x10] sm:$0xff] }
 0x28a   :  { %v264_v45 = vmax.f32 %v262_v44, 0.0  ;;  %v544_v44 = vld [vmem:[%s1177_s13 + $0x18] sm:$0xff]  ;;  %745 = vmatprep.subr.bf16.mxu1 %v744_v42 }
 0x28c   :  { %700 = vmatmul.mubr.msk.f32.vlgmr.msra.gmra.mrb[0].mxu1 %vm219_vm1, %v264_v45  ;;  %v748_v45 = vpack.c.bf16 %v544_v44, %v543_v43 }
 0x28d   :  { %747 = vmatpush3.bf16.msra.mxu1 %v744_v42 }
 0x28e   :  { %749 = vmatprep.subr.bf16.mxu1 %v748_v45 }
 0x291   :  { %751 = vmatpush3.bf16.msra.mxu1 %v748_v45 }
 0x35f   :  { %v701_v47 = vpop.f32.mrb[0].mxu1 }
 0x360   :  { %v354_v48 = vadd.f32 %v701_v47, %v649_v46  ;;  %v348_v49 = vpop.f32.mrb[1].mxu1 }
 0x361   :  { %v349_v50 = vadd.f32 %v649_v46, %v348_v49 }
 0x362   :  { %v362_v51 = vsel %vm219_vm1, %v354_v48, 0.0 }
 0x363   :  { %363 = vadd.xlane.f32.xlu1 %v362_v51  ;;  %v359_v52 = vsel %vm219_vm1, %v349_v50, 0.0 }
 0x364   :  { %360 = vadd.xlane.f32.xlu0 %v359_v52 }
 0x3f0   :  { %v364_v53 = vpop.xlane.xlu1 %363 }
 0x3f1   :  { %v366_v54 = vmul.f32 0.03125, %v364_v53  ;;  %v361_v55 = vpop.xlane.xlu0 %360  ;;  %v657_v53 = vld [vmem:[%s1175_s11] ss:$0 sm:$0xff] }
 0x3f2   :  { %v365_v56 = vmul.f32 0.03125, %v361_v55 }
 0x3f3   :  { %v368_v57 = vsub.f32 %v354_v48, %v366_v54 }
 0x3f4   :  { %v367_v58 = vsub.f32 %v349_v50, %v365_v56 }
 0x3f5   :  { %v370_v59 = vmul.f32 %v368_v57, %v368_v57 }
 0x3f6   :  { %v369_v60 = vmul.f32 %v367_v58, %v367_v58 }
 0x3f7   :  { %v374_v61 = vsel %vm219_vm1, %v370_v59, 0.0 }
 0x3f8   :  { %375 = vadd.xlane.f32.xlu1 %v374_v61  ;;  %v371_v62 = vsel %vm219_vm1, %v369_v60, 0.0 }
 0x3f9   :  { %372 = vadd.xlane.f32.xlu0 %v371_v62 }
 0x485   :  { %v376_v5 = vpop.xlane.xlu1 %375 }
 0x486   :  { %v378_v6 = vmul.f32 0.03125, %v376_v5  ;;  %v373_v7 = vpop.xlane.xlu0 %372 }
 0x487   :  { %v377_v8 = vmul.f32 0.03125, %v373_v7 }
 0x488   :  { %v380_v9 = vadd.f32 1e-05, %v378_v6 }
 0x489   :  { %v379_v10 = vadd.f32 1e-05, %v377_v8 }
 0x48a   :  { %764 = vrsqrt.f32 %v380_v9 }
 0x48b   :  { %766 = vrsqrt.f32 %v379_v10 }
 0x494   :  { %v765_v11 = vpop.eup %764 }
 0x495   :  { %v767_v13 = vpop.eup %766  ;;  %v384_v14 = vmul.f32 %v765_v11, %v368_v57  ;;  %v658_v57 = vld [vmem:[%s1176_s12] ss:$0 sm:$0xff] }
 0x496   :  { %v383_v16 = vmul.f32 %v767_v13, %v367_v58 }
 0x497   :  { %v392_v17 = vmul.f32 %v652_v12, %v384_v14 }
 0x498   :  { %v391_v18 = vmul.f32 %v652_v12, %v383_v16 }
 0x499   :  { %v400_v19 = vadd.f32 %v653_v15, %v392_v17 }
 0x49a   :  { %v399_v20 = vadd.f32 %v653_v15, %v391_v18 }
 0x49b   :  { %v402_v22 = vmax.f32 %v400_v19, 0.0 }
 0x49c   :  { %v401_v21 = vmax.f32 %v399_v20, 0.0 }
 0x49e   :  { %710 = vmatprep.mubr.msk.f32.mxu0 %vm219_vm1, %v401_v21 }
 0x49f   :  { %711 = vmatmul.mubr.msk.f32.vlgmr.msra.gmra.mrb[2].mxu0 %vm219_vm1, %v402_v22 }
 0x572   :  { %v712_v24 = vpop.f32.mrb[2].mxu0 }
 0x573   :  { %v492_v25 = vadd.f32 %v712_v24, %v654_v23  ;;  %v486_v26 = vpop.f32.mrb[3].mxu0 }
 0x574   :  { %v487_v27 = vadd.f32 %v654_v23, %v486_v26 }
 0x575   :  { %v500_v28 = vsel %vm219_vm1, %v492_v25, 0.0 }
 0x576   :  { %501 = vadd.xlane.f32.xlu1 %v500_v28  ;;  %v497_v29 = vsel %vm219_vm1, %v487_v27, 0.0 }
 0x577   :  { %498 = vadd.xlane.f32.xlu0 %v497_v29 }
 0x603   :  { %v502_v30 = vpop.xlane.xlu1 %501 }
 0x604   :  { %v504_v31 = vmul.f32 0.03125, %v502_v30  ;;  %v499_v32 = vpop.xlane.xlu0 %498 }
 0x605   :  { %v503_v33 = vmul.f32 0.03125, %v499_v32 }
 0x606   :  { %v506_v34 = vsub.f32 %v492_v25, %v504_v31 }
 0x607   :  { %v505_v35 = vsub.f32 %v487_v27, %v503_v33 }
 0x608   :  { %v508_v36 = vmul.f32 %v506_v34, %v506_v34 }
 0x609   :  { %v507_v37 = vmul.f32 %v505_v35, %v505_v35 }
 0x60a   :  { %v512_v38 = vsel %vm219_vm1, %v508_v36, 0.0 }
 0x60b   :  { %513 = vadd.xlane.f32.xlu1 %v512_v38  ;;  %v509_v39 = vsel %vm219_vm1, %v507_v37, 0.0 }
 0x60c   :  { %510 = vadd.xlane.f32.xlu0 %v509_v39 }
 0x698   :  { %v514_v46 = vpop.xlane.xlu1 %513 }
 0x699   :  { %v516_v47 = vmul.f32 0.03125, %v514_v46  ;;  %v511_v48 = vpop.xlane.xlu0 %510 }
 0x69a   :  { %v515_v49 = vmul.f32 0.03125, %v511_v48 }
 0x69b   :  { %v518_v50 = vadd.f32 1e-05, %v516_v47 }
 0x69c   :  { %v517_v51 = vadd.f32 1e-05, %v515_v49 }
 0x69d   :  { %768 = vrsqrt.f32 %v518_v50 }
 0x69e   :  { %770 = vrsqrt.f32 %v517_v51 }
 0x6a7   :  { %v769_v52 = vpop.eup %768 }
 0x6a8   :  { %v771_v54 = vpop.eup %770  ;;  %v522_v55 = vmul.f32 %v769_v52, %v506_v34 }
 0x6a9   :  { %v521_v56 = vmul.f32 %v771_v54, %v505_v35 }
 0x6aa   :  { %v530_v58 = vmul.f32 %v657_v53, %v522_v55 }
 0x6ab   :  { %v529_v59 = vmul.f32 %v657_v53, %v521_v56 }
 0x6ac   :  { %v538_v60 = vadd.f32 %v658_v57, %v530_v58 }
 0x6ad   :  { %v537_v61 = vadd.f32 %v658_v57, %v529_v59 }
 0x6ae   :  { %v540_v63 = vmax.f32 %v538_v60, 0.0 }
 0x6af   :  { %v539_v62 = vmax.f32 %v537_v61, 0.0 }
 0x6b1   :  { %721 = vmatprep.mubr.msk.f32.mxu1 %vm219_vm1, %v539_v62 }
 0x6b2   :  { %722 = vmatmul.mubr.msk.f32.vlgmr.msra.gmra.mrb[2].mxu1 %vm219_vm1, %v540_v63 }
 0x785   :  { %v723_v1 = vpop.f32.mrb[2].mxu1 }
 0x786   :  { %v630_v2 = vadd.f32 %v723_v1, %v659_v0  ;;  %v624_v3 = vpop.f32.mrb[3].mxu1 }
 0x787   :  { %v625_v4 = vadd.f32 %v659_v0, %v624_v3 }
 0x788   :  { %635 = vst.msk [vmem:[%s1179_s15 + $0x8] sm:$0xff] %vm633_vm2, %v630_v2 }
 0x789   :  { %634 = vst.msk [vmem:[%s1179_s15] sm:$0xff] %vm633_vm2, %v625_v4 }
 0x78a   :  { %640 = vsyncpa [#allocation3], 1 }
 0x78b   :  { %641 = vsyncpa [#allocation5], 1 }
 0x78c   :  { %642 = vsyncpa [#allocation8], 1 }
 0x78d   :  { %643 = vsyncpa [#allocation11], 1 }

</bundles_post_ra>
